<compile_context>
chip_gen: v6e
topology: v6e:2x2x1
jax: 0.10.0
libtpu: 0.0.40
codegen_flags: <defaults>
</compile_context>

<pallas_src>
import math

import jax
import jax.numpy as jnp
from jax.experimental import pallas as pl
from jax.experimental.pallas import tpu as pltpu


def _value_kernel(x_ref, w1_ref, b1_ref, w2_ref, b2_ref, o_ref):
    """One batch tile.

    x_ref : (tb, F)     activations for this batch tile
    w1_ref: (H, F)      layer-1 weight, PyTorch (out, in) layout, VMEM-resident
    b1_ref: (H, 1)
    w2_ref: (H, 1)      layer-2 weight as a column
    b2_ref: (1, 1)
    o_ref : (1, 1, tb)  lane-dense value row for this tile
    """
    x = x_ref[...]                                     # (tb, F)

    # Layer 1 in the transposed orientation: h[H, tb] = W1[H, F] . x[tb, F]^T.
    # Contraction on the minor dim of both operands ("NT" matmul) -> no
    # explicit transpose, MXU-friendly, and all downstream vregs lane-dense.
    h = jnp.einsum("hf,bf->hb", w1_ref[...], x,
                   preferred_element_type=jnp.float32)  # (H, tb)
    h = h + b1_ref[...]

    # Dropout(p=0.0) == identity.
    # TODO(synk): training-mode dropout (p > 0) not implemented.

    # LeakyReLU, default negative slope 0.01.
    h = jnp.maximum(h, 0.01 * h)

    # Layer 2 on the VPU/XLU instead of a single-column MXU matmul:
    # value row (1, tb) = sum over the H sublanes of w2 * h   (lane-dense).
    v = jnp.sum(h * w2_ref[...], axis=0, keepdims=True) + b2_ref[...]

    o_ref[0, :, :] = v.astype(o_ref.dtype)


def _round_up(x, m):
    return ((x + m - 1) // m) * m


def _pick_tile(batch, tile_b):
    if batch <= 1024:
        # Single block equal to the full array (legal for any batch size).
        return batch
    # Tiled path: tile must be a multiple of 128 (lane-dense output row),
    # at most `batch` (first block fully in bounds), and small enough that the
    # grid has >= 2 steps so v7x's two TensorCores both get work.
    tb = min(tile_b, _round_up(batch // 2, 128), (batch // 128) * 128)
    return max(tb, 128)


def _vmem_limit_bytes():
    # ~75% of physical VMEM: ~48 MiB on v7x (64 MiB), ~96 MiB on v5e/v6e (128 MiB).
    try:
        cap = pltpu.get_tpu_info().vmem_capacity_bytes
    except Exception:
        cap = 64 * 1024 * 1024
    return min(int(cap) * 3 // 4, 100 * 1024 * 1024)


def value_forward(x, w1, b1, w2, b2, *, tile_b=16 * 1024):
    """ValueNetwork forward.

    x : (B, in_features) float32
    w1: (hidden, in_features)   -- PyTorch nn.Linear layout (out, in)
    b1: (hidden,)
    w2: (hidden,) or (1, hidden)
    b2: scalar-like, e.g. (1,)
    returns (B, 1) float32
    """
    B, F = x.shape
    H = w1.shape[0]

    b1c = jnp.reshape(b1, (H, 1)).astype(jnp.float32)
    w2c = jnp.reshape(w2, (H, 1)).astype(jnp.float32)
    b2c = jnp.reshape(b2, (1, 1)).astype(jnp.float32)

    tb = _pick_tile(B, tile_b)
    nsteps = pl.cdiv(B, tb)           # ragged grid: last tile OOB-masked, no jnp.pad

    out = pl.pallas_call(
        _value_kernel,
        out_shape=jax.ShapeDtypeStruct((nsteps, 1, tb), jnp.float32),
        grid=(nsteps,),
        in_specs=[
            pl.BlockSpec((tb, F), lambda i: (i, 0)),   # x: tiled over batch
            pl.BlockSpec((H, F), lambda i: (0, 0)),    # w1: VMEM-resident
            pl.BlockSpec((H, 1), lambda i: (0, 0)),    # b1: resident
            pl.BlockSpec((H, 1), lambda i: (0, 0)),    # w2: resident
            pl.BlockSpec((1, 1), lambda i: (0, 0)),    # b2: resident
        ],
        out_specs=pl.BlockSpec((1, 1, tb), lambda i: (i, 0, 0)),
        compiler_params=pltpu.CompilerParams(
            dimension_semantics=("parallel",),         # batch tiles independent
            vmem_limit_bytes=_vmem_limit_bytes(),
        ),
    )(x, w1, b1c, w2c, b2c)

    # (nsteps, 1, tb) -> flat batch order -> (B, 1).  The tail of the last
    # tile (if B % tb != 0) holds don't-care values from OOB-masked input rows
    # and is sliced off here.
    return out.reshape(nsteps * tb)[:B].reshape(B, 1)


def init_params(key, in_features, hidden_size):
    """Mirror the PyTorch module: kaiming_normal_ weights (fan_in, gain=sqrt(2))
    and default nn.Linear uniform biases.  Weights kept in (out, in) layout."""
    k1, k2, k3, k4 = jax.random.split(key, 4)

    def kaiming_normal(k, fan_out, fan_in):
        std = math.sqrt(2.0 / fan_in)
        return std * jax.random.normal(k, (fan_out, fan_in), dtype=jnp.float32)

    w1 = kaiming_normal(k1, hidden_size, in_features)               # (H, F)
    bound1 = 1.0 / math.sqrt(in_features)
    b1 = jax.random.uniform(k2, (hidden_size,), jnp.float32, -bound1, bound1)

    w2 = kaiming_normal(k3, 1, hidden_size).reshape(hidden_size)    # (H,)
    bound2 = 1.0 / math.sqrt(hidden_size)
    b2 = jax.random.uniform(k4, (1,), jnp.float32, -bound2, bound2)
    return w1, b1, w2, b2


def reference_forward(x, w1, b1, w2, b2):
    """Plain-JAX reference matching the PyTorch semantics (dropout p=0)."""
    h = x @ w1.T + b1[None, :]
    h = jnp.where(h >= 0, h, 0.01 * h)
    return jnp.sum(h * w2[None, :], axis=-1, keepdims=True) + jnp.reshape(b2, (1, 1))


def _bf16_round(a):
    # The MXU's default f32 matmul path rounds operands to bf16; rounding the
    # test data up front lets kernel and reference agree to ~f32 precision
    # without forcing Precision.HIGHEST inside the kernel.
    return a.astype(jnp.bfloat16).astype(jnp.float32)


if __name__ == "__main__":
    in_features = 16
    hidden_size = 32

    key = jax.random.PRNGKey(0)
    kx, kp, kx2 = jax.random.split(key, 3)
    w1, b1, w2, b2 = init_params(kp, in_features, hidden_size)
    w1 = _bf16_round(w1)

    # Small batch: single full-array block path.
    batch = 2
    x = _bf16_round(jax.random.normal(kx, (batch, in_features), dtype=jnp.float32))
    v = value_forward(x, w1, b1, w2, b2)
    jax.block_until_ready(v)
    v_ref = reference_forward(x, w1, b1, w2, b2)
    assert v.shape == (batch, 1)
    assert jnp.allclose(v, v_ref, atol=1e-3, rtol=1e-3), \
        float(jnp.max(jnp.abs(v - v_ref)))

    # Larger batch: exercises the batch-tiled grid, the >=2-step cap and the
    # ragged (OOB-masked) last tile -- no jnp.pad anywhere.
    batch2 = 2500
    x2 = _bf16_round(jax.random.normal(kx2, (batch2, in_features), dtype=jnp.float32))
    v2 = value_forward(x2, w1, b1, w2, b2)
    jax.block_until_ready(v2)
    v2_ref = reference_forward(x2, w1, b1, w2, b2)
    assert v2.shape == (batch2, 1)
    assert jnp.allclose(v2, v2_ref, atol=1e-3, rtol=1e-3), \
        float(jnp.max(jnp.abs(v2 - v2_ref)))

    print("KERNEL_OK")
</pallas_src>

<mosaic_0001>
module attributes {stable_mosaic.version = 11 : i64} {
  func.func @_value_kernel(%arg0: i32, %arg1: memref<2x16xf32, #tpu.memory_space<vmem>>, %arg2: memref<32x16xf32, #tpu.memory_space<vmem>>, %arg3: memref<32x1xf32, #tpu.memory_space<vmem>>, %arg4: memref<32x1xf32, #tpu.memory_space<vmem>>, %arg5: memref<1x1xf32, #tpu.memory_space<vmem>>, %arg6: memref<1x1x2xf32, #tpu.memory_space<vmem>>) attributes {dimension_semantics = [#tpu.dimension_semantics<parallel>], iteration_bounds = array<i64: 1>, scalar_prefetch = 0 : i64, scratch_operands = 0 : i64, tpu.core_type = #tpu.core_type<tc>, window_params = [{transform_indices = @transform_0, window_bounds = array<i64: 2, 16>}, {pipeline_mode = #tpu.pipeline_mode<synchronous>, transform_indices = @transform_1, window_bounds = array<i64: 32, 16>}, {pipeline_mode = #tpu.pipeline_mode<synchronous>, transform_indices = @transform_2, window_bounds = array<i64: 32, 1>}, {pipeline_mode = #tpu.pipeline_mode<synchronous>, transform_indices = @transform_3, window_bounds = array<i64: 32, 1>}, {pipeline_mode = #tpu.pipeline_mode<synchronous>, transform_indices = @transform_4, window_bounds = array<i64: 1, 1>}, {transform_indices = @transform_5, window_bounds = array<i64: 1, 1, 2>}]} {
    %c0 = arith.constant 0 : index
    %c0_0 = arith.constant 0 : index
    %0 = vector.load %arg1[%c0, %c0_0] : memref<2x16xf32, #tpu.memory_space<vmem>>, vector<2x16xf32>
    %c0_1 = arith.constant 0 : index
    %c0_2 = arith.constant 0 : index
    %1 = vector.load %arg2[%c0_1, %c0_2] : memref<32x16xf32, #tpu.memory_space<vmem>>, vector<32x16xf32>
    "tpu.trace_start"() <{level = 10 : i32, message = "hf,bf->hb"}> : () -> ()
    %cst = arith.constant dense<0.000000e+00> : vector<32x2xf32>
    %2 = tpu.matmul %1, %0, %cst {dimension_numbers = #tpu.dot_dimension_numbers<[1], [1], [0], [0], [0, 0, 1, 0], [], []>} : vector<32x16xf32>, vector<2x16xf32>, vector<32x2xf32> -> vector<32x2xf32>
    "tpu.trace_stop"() : () -> ()
    %c0_3 = arith.constant 0 : index
    %c0_4 = arith.constant 0 : index
    %3 = vector.load %arg3[%c0_3, %c0_4] : memref<32x1xf32, #tpu.memory_space<vmem>>, vector<32x1xf32>
    %4 = vector.broadcast %3 : vector<32x1xf32> to vector<32x2xf32>
    %5 = arith.addf %2, %4 : vector<32x2xf32>
    %cst_5 = arith.constant 0.00999999977 : f32
    %6 = vector.broadcast %cst_5 : f32 to vector<32x2xf32>
    %7 = arith.mulf %6, %5 : vector<32x2xf32>
    %8 = arith.maximumf %5, %7 : vector<32x2xf32>
    %c0_6 = arith.constant 0 : index
    %c0_7 = arith.constant 0 : index
    %9 = vector.load %arg4[%c0_6, %c0_7] : memref<32x1xf32, #tpu.memory_space<vmem>>, vector<32x1xf32>
    %10 = vector.broadcast %9 : vector<32x1xf32> to vector<32x2xf32>
    %11 = arith.mulf %8, %10 : vector<32x2xf32>
    %cst_8 = arith.constant dense<0.000000e+00> : vector<2xf32>
    %12 = vector.multi_reduction <add>, %11, %cst_8 [0] : vector<32x2xf32> to vector<2xf32>
    %13 = vector.shape_cast %12 : vector<2xf32> to vector<1x2xf32>
    %c0_9 = arith.constant 0 : index
    %c0_10 = arith.constant 0 : index
    %14 = vector.load %arg5[%c0_9, %c0_10] : memref<1x1xf32, #tpu.memory_space<vmem>>, vector<1x1xf32>
    %15 = vector.broadcast %14 : vector<1x1xf32> to vector<1x2xf32>
    %16 = arith.addf %13, %15 : vector<1x2xf32>
    %c0_11 = arith.constant 0 : index
    %c0_12 = arith.constant 0 : index
    %c0_13 = arith.constant 0 : index
    %17 = vector.load %arg6[%c0_11, %c0_12, %c0_13] : memref<1x1x2xf32, #tpu.memory_space<vmem>>, vector<1x1x2xf32>
    %18 = vector.shape_cast %17 : vector<1x1x2xf32> to vector<1x2xf32>
    %19 = vector.shape_cast %16 : vector<1x2xf32> to vector<1x1x2xf32>
    tpu.vector_store %arg6[%c0_11, %c0_12, %c0_13], %19 {strides = array<i32>} : memref<1x1x2xf32, #tpu.memory_space<vmem>>, vector<1x1x2xf32>,
    return
  }
  func.func @transform_0(%arg0: i32) -> (i32, i32) {
    %c0_i32 = arith.constant 0 : i32
    %c0_i32_0 = arith.constant 0 : i32
    return %arg0, %c0_i32 : i32, i32
  }
  func.func @transform_1(%arg0: i32) -> (i32, i32) {
    %c0_i32 = arith.constant 0 : i32
    %c0_i32_0 = arith.constant 0 : i32
    %c0_i32_1 = arith.constant 0 : i32
    return %c0_i32, %c0_i32_0 : i32, i32
  }
  func.func @transform_2(%arg0: i32) -> (i32, i32) {
    %c0_i32 = arith.constant 0 : i32
    %c0_i32_0 = arith.constant 0 : i32
    %c0_i32_1 = arith.constant 0 : i32
    return %c0_i32, %c0_i32_0 : i32, i32
  }
  func.func @transform_3(%arg0: i32) -> (i32, i32) {
    %c0_i32 = arith.constant 0 : i32
    %c0_i32_0 = arith.constant 0 : i32
    %c0_i32_1 = arith.constant 0 : i32
    return %c0_i32, %c0_i32_0 : i32, i32
  }
  func.func @transform_4(%arg0: i32) -> (i32, i32) {
    %c0_i32 = arith.constant 0 : i32
    %c0_i32_0 = arith.constant 0 : i32
    %c0_i32_1 = arith.constant 0 : i32
    return %c0_i32, %c0_i32_0 : i32, i32
  }
  func.func @transform_5(%arg0: i32) -> (i32, i32, i32) {
    %c0_i32 = arith.constant 0 : i32
    %c0_i32_0 = arith.constant 0 : i32
    %c0_i32_1 = arith.constant 0 : i32
    return %arg0, %c0_i32, %c0_i32_0 : i32, i32, i32
  }
}

</mosaic_0001>

<bundles_post_ra>
// kernel: tpu_custom_call.1
= control target key start
LH: loop header
LB: loop body
LE: loop exit
PB: predicated region body
PF: predicated region fallthrough
CT: control target
= control target key end

     0   :  { %s361_s0 = inlined_call_operand.vmem [shape: f32[2,16], index: 0, kind: input, shape index: {}]   ;;  %s362_s1 = inlined_call_operand.vmem [shape: f32[32,16], index: 1, kind: input, shape index: {}]   ;;  %s363_s2 = inlined_call_operand.vmem [shape: f32[32,1], index: 2, kind: input, shape index: {}]   ;;  %s364_s3 = inlined_call_operand.vmem [shape: f32[32,1], index: 3, kind: input, shape index: {}]   ;;  %s365_s4 = inlined_call_operand.<no memory space> [shape: f32[1,1], index: 4, kind: input, shape index: {}]   ;;  %s366_s5 = inlined_call_operand.hbm [shape: f32[1,1,2], index: 5, kind: output, shape index: {}]  }
   0x1   :  { %v10_v0 = vstv %s365_s4 }
   0x2   :  { %11 = vst [vmem:[#allocation2] sm:$0x1] %v10_v0 }
   0x3   :  { %v23_v1 = vld [vmem:[%s361_s0] sm:$0x3]  ;;  %vm52_vm0 = vcmask 130048   ;;  %v26_v3 = vld [vmem:[%s362_s1 + $0x10] sm:$0xff]  ;;  %v25_v4 = vld [vmem:[%s362_s1 + $0x8] sm:$0xff]  ;;  %v276_v8 = vmov 0  }
   0x4   :  { %v24_v2 = vld [vmem:[%s362_s1] sm:$0xff]  ;;  %240 = vmatprep.subr.msk.mxu0 %vm52_vm0, %v23_v1  ;;  %248 = vmatprep.subr.msk.mxu1 %vm52_vm0, %v23_v1  ;;  %v27_v5 = vld [vmem:[%s362_s1 + $0x18] sm:$0xff]  ;;  %v30_v7 = vld [vmem:[%s363_s2 + $0x10] sm:$0xff] }
   0x5   :  { %241 = vmatpush3.xpose.msk.msra.mxu0 %vm52_vm0, %v23_v1  ;;  %249 = vmatpush3.xpose.msk.msra.mxu1 %vm52_vm0, %v23_v1  ;;  %v28_v6 = vld [vmem:[%s363_s2] sm:$0xff] }
   0x6   :  { %242 = vmatprep.mubr.msk.f32.mxu0 %vm52_vm0, %v24_v2  ;;  %245 = vmatprep.mubr.msk.f32.mxu1 %vm52_vm0, %v26_v3 }
   0x7   :  { %252 = vset.pattern.permute.xlu0 %v276_v8  ;;  %253 = vset.pattern.permute.xlu1 %v276_v8 }
   0x8   :  { %12 = vsyncpa [#allocation4], 0  ;;  %243 = vmatmul.mubr.msk.f32.vlgmr.msra.gmra.mxu0 %vm52_vm0, %v25_v4  ;;  %246 = vmatmul.mubr.msk.f32.vlgmr.msra.gmra.mxu1 %vm52_vm0, %v27_v5  ;;  %v29_v9 = vld [vmem:[%s363_s2 + $0x8] sm:$0xff]  ;;  %v31_v10 = vld [vmem:[%s363_s2 + $0x18] sm:$0xff]  ;;  %vm189_vm1 = vcmask 15360   ;;  %v209_v50 = vlaneseq  ;;  %s277_s2 = smov [#allocation3]  }
   0x9   :  { %34 = vperm.xlu0 %252, %v28_v6   ;;  %44 = vperm.xlu1 %253, %v30_v7   ;;  %v161_v11 = vld [vmem:[%s364_s3] sm:$0xff]  ;;  %v162_v12 = vld [vmem:[%s364_s3 + $0x8] sm:$0xff]  ;;  %v163_v13 = vld [vmem:[%s364_s3 + $0x10] sm:$0xff]  ;;  %vm214_vm2 = vcmask 8192  }
   0xa   :  { %v164_v14 = vld [vmem:[%s364_s3 + $0x18] sm:$0xff]  ;;  %v203_v15 = vld [vmem:[#allocation2] sm:$0x1]  ;;  %v210_v53 = vshrl.u32 %v209_v50, 7  ;;  %s222_s3 = sshll.u32 %s277_s2, 4  ;;  %s223_s3 = int_to_ptr.vmem [resolvable:$true] %s222_s3 }
   0xb   :  { %s254_s18 = scalar_lea.vmem %s223_s3, 16  ;;  %s258_s19 = scalar_lea.vmem %s223_s3, 32 }
   0xc   :  { %v211_v56 = vsub.s32 0, %v210_v53  ;;  %p255_p0 = scmp.ne.s32.totalorder %s223_s3, %s254_s18  ;;  %p259_p1 = scmp.lt.s32.totalorder %s223_s3, %s223_s3 }
   0xd   :  { %39 = vperm.xlu0 %252, %v29_v9   ;;  %49 = vperm.xlu1 %253, %v31_v10   ;;  %p260_p2 = scmp.lt.s32.totalorder %s258_s19, %s254_s18 }
   0xf   :  { %p261_p3 = por %p260_p2, %p259_p1 }
  0x11   :  { %167 = vperm.xlu0 %252, %v161_v11   ;;  %172 = vperm.xlu1 %253, %v162_v12   ;;  %p262_p4 = pnand %p261_p3, %p255_p0 }
  0x15   :  { %177 = vperm.xlu0 %252, %v163_v13   ;;  %182 = vperm.xlu1 %253, %v164_v14  }
  0x19   :  { %206 = vperm.xlu0 %252, %v203_v15  }
  0x84   :  { %v35_v16 = vpop.permute.xlu0 %34  ;;  %v45_v17 = vpop.permute.xlu1 %44 }
  0x88   :  { %v40_v18 = vpop.permute.xlu0 %39  ;;  %v50_v19 = vpop.permute.xlu1 %49 }
  0x8c   :  { %v168_v22 = vpop.permute.xlu0 %167  ;;  %v173_v31 = vpop.permute.xlu1 %172 }
  0x90   :  { %v178_v39 = vpop.permute.xlu0 %177  ;;  %v183_v42 = vpop.permute.xlu1 %182 }
  0x94   :  { %v207_v58 = vpop.permute.xlu0 %206 }
  0x95   :  { %v212_v60 = vrot.slane %v207_v58, %v211_v56 }
  0xc8   :  { %v244_v20 = vpop.f32.mrf.mxu0  ;;  %v247_v21 = vpop.f32.mrf.mxu1 }
  0xc9   :  { %v140_v23 = vadd.f32 %v244_v20, %v40_v18  ;;  %v150_v24 = vadd.f32 %v247_v21, %v50_v19 }
  0xca   :  { %v134_v25 = vpop.f32.mrf.mxu0  ;;  %v144_v26 = vpop.f32.mrf.mxu1 }
  0xcb   :  { %v154_v27 = vmul.f32 0.01, %v140_v23  ;;  %v156_v28 = vmul.f32 0.01, %v150_v24  ;;  %v135_v29 = vadd.f32 %v134_v25, %v35_v16  ;;  %v145_v30 = vadd.f32 %v144_v26, %v45_v17 }
  0xcd   :  { %v158_v32 = vmax.f32 %v140_v23, %v154_v27  ;;  %v153_v33 = vmul.f32 0.01, %v135_v29  ;;  %v155_v34 = vmul.f32 0.01, %v145_v30  ;;  %v160_v36 = vmax.f32 %v150_v24, %v156_v28 }
  0xcf   :  { %v186_v35 = vmul.f32 %v173_v31, %v158_v32  ;;  %v157_v37 = vmax.f32 %v135_v29, %v153_v33  ;;  %v159_v38 = vmax.f32 %v145_v30, %v155_v34  ;;  %v188_v44 = vmul.f32 %v183_v42, %v160_v36 }
  0xd1   :  { %v185_v40 = vmul.f32 %v168_v22, %v157_v37  ;;  %v187_v41 = vmul.f32 %v178_v39, %v159_v38  ;;  %v191_v43 = vsel %vm189_vm1, %v186_v35, 0.0  ;;  %v195_v49 = vsel %vm189_vm1, %v188_v44, 0.0 }
  0xd3   :  { %v190_v45 = vsel %vm189_vm1, %v185_v40, 0.0  ;;  %v193_v47 = vsel %vm189_vm1, %v187_v41, 0.0 }
  0xd4   :  { %v192_v46 = vadd.f32 %v191_v43, %v190_v45 }
  0xd6   :  { %v194_v48 = vadd.f32 %v193_v47, %v192_v46 }
  0xd8   :  { %v196_v51 = vadd.f32 %v195_v49, %v194_v48 }
  0xda   :  { %v197_v52 = vrot.slane %v196_v51, 4 }
  0xdc   :  { %v198_v54 = vadd.f32 %v197_v52, %v196_v51 }
  0xde   :  { %v199_v55 = vrot.slane %v198_v54, 2 }
  0xe0   :  { %v200_v57 = vadd.f32 %v199_v55, %v198_v54 }
  0xe2   :  { %v201_v59 = vrot.slane %v200_v57, 1 }
  0xe4   :  { %v202_v61 = vadd.f32 %v201_v59, %v200_v57 }
  0xe6   :  { %v213_v62 = vadd.f32 %v212_v60, %v202_v61 }
  0xe8   :  { %215 = vst.msk [vmem:[#allocation3] sm:$0x1] %vm214_vm2, %v213_v62 }
  0xe9   :  { %265 = shalt.err (!%p262_p4)
}
  0xea   :  { %225 = dma.vmem_to_hbm [thread:$0]  %s223_s3, 16, %s366_s5, [#allocation4]  }
  0xeb   :  { %274 = dma.done.wait [#allocation4], 16  }
  0xec   :  { %275 = vsyncadd [#allocation4], 4294967280 }
  0xed   :  { %229 = vsyncpa [#allocation4], 1 }

</bundles_post_ra>
